<compile_context>
chip_gen: v5e
topology: v5e:2x2
jax: 0.10.0
libtpu: 0.0.40
codegen_flags: <defaults>
</compile_context>

<pallas_src>
import functools
import math

import jax
import jax.numpy as jnp
from jax import lax
from jax.experimental import pallas as pl
from jax.experimental.pallas import tpu as pltpu


# --------------------------------------------------------------------------
# Kernel
# --------------------------------------------------------------------------
def _rnn_block_kernel(x_ref, h0_ref, wi_ref, wh_ref, b_ref, out_ref,
                      pre_ref, h_ref, *, tblk, seq_len, has_time_pad, unroll):
    """One grid step == `tblk` recurrence steps of one (direction, batch chunk).

    Time-major blocks (batch in the sublane dim, hidden in the lane dim):
      x_ref  : (tblk, bsc, in_p)       current time block of the input
      h0_ref : (bsc, hid)              initial hidden state of this direction
      wi_ref : (in_p, hid)             input weights      (MXU dtype)
      wh_ref : (hid, hid)              recurrent weights  (MXU dtype)
      b_ref  : (1, hid)                bias               (f32)
      out_ref: (tblk, bsc, hid)        output block
      pre_ref: (tblk, bsc, hid) f32    VMEM scratch for hoisted x@Wi + B
      h_ref  : (bsc, hid)       f32    VMEM scratch carrying h across blocks
    """
    d = pl.program_id(0)          # 0 = forward direction, 1 = reverse
    g = pl.program_id(2)          # time-block counter (per direction / chunk)
    n_tblk = pl.num_programs(2)

    @pl.when(g == 0)
    def _():
        h_ref[...] = h0_ref[...].astype(jnp.float32)

    bsc = x_ref.shape[1]
    in_p = x_ref.shape[2]
    hid = wh_ref.shape[1]

    # ---- Hoisted input projection: ONE MXU matmul per time block, written
    # into an explicit f32 VMEM scratch so the recurrence below reads one
    # aligned (bsc, hid) slab per step instead of keeping a huge value live
    # in vregs (which previously forced spill/reload on the serial path).
    xb = x_ref[...].reshape(tblk * bsc, in_p).astype(wi_ref.dtype)
    pre_ref[...] = (
        jnp.dot(xb, wi_ref[...], preferred_element_type=jnp.float32)
        + b_ref[...]
    ).reshape(tblk, bsc, hid)

    wh = wh_ref[...]              # hoisted weight load (MXU dtype)
    mxu_dtype = wh.dtype

    # Global time of in-block step 0 (index_map already picked the right
    # time block for this direction).
    t_blk_idx = g + d * (n_tblk - 1 - 2 * g)
    t_base = t_blk_idx * tblk

    def run_steps(i, h):
        # `unroll`-way manual unroll inside a rolled fori_loop: the scheduler
        # can overlap step j+1's h@Wh MXU push with step j's tanh (EUP) and
        # full-vreg output store, while live ranges / i-memory stay bounded.
        base = i * unroll
        for u in range(unroll):
            j = base + u
            # forward (d=0): j_eff = j ; reverse (d=1): j_eff = tblk-1-j
            j_eff = d * (tblk - 1) + (1 - 2 * d) * j
            gate = pre_ref[j_eff] + jnp.dot(
                h.astype(mxu_dtype), wh, preferred_element_type=jnp.float32)
            h_new = jnp.tanh(gate)
            if has_time_pad:
                # Steps past the real sequence (zero-padded tail) must leave
                # the reverse-direction state untouched.
                t = t_base + j_eff
                in_range = jnp.full(h_new.shape, t, jnp.int32) < seq_len
                h_new = jnp.where(in_range, h_new, h)
            out_ref[j_eff] = h_new.astype(out_ref.dtype)
            h = h_new
        return h

    h_last = lax.fori_loop(0, tblk // unroll, run_steps, h_ref[...])
    h_ref[...] = h_last


# --------------------------------------------------------------------------
# Wrapper
# --------------------------------------------------------------------------
def _round_up(x, m):
    return (x + m - 1) // m * m


def _device_kind():
    try:
        return jax.devices()[0].device_kind.lower()
    except Exception:
        return ""


def _default_mxu_dtype():
    # bf16 weights are the fast MXU path on v6e / v7x (and halve Wh's VMEM
    # footprint); keep f32 on v5e and older.
    kind = _device_kind()
    if any(t in kind for t in ("v6", "v7")):
        return jnp.bfloat16
    return jnp.float32


def _default_batch_splits(ndir, bs_pad):
    # On multi-TensorCore parts (v7x) the unidirectional case has only one
    # "parallel" work item; split the batch so both cores are busy.
    if ndir == 1 and bs_pad >= 16 and bs_pad % 16 == 0 and "v7" in _device_kind():
        return 2
    return 1


def chaotic_rnn_forward(x, params, bidirection=False, init_states=None,
                        mxu_dtype=None, batch_splits=None):
    """Equivalent of ChaoticRNN.forward (chaotic=False).

    x : (bs, seq, inputSize), batch-major (PyTorch convention)
    returns (output, ht):
        unidirectional: output (bs, seq, hidden),    ht (bs, hidden)
        bidirectional : output (bs, seq, 2*hidden),  ht (bs, 2*hidden)
    """
    bs, seq, in_sz = x.shape
    hid = params["Wi"].shape[1]
    ndir = 2 if bidirection else 1
    out_dtype = x.dtype

    if mxu_dtype is None:
        mxu_dtype = _default_mxu_dtype()

    # ---- Shape padding: lane-dense hidden (x128), sublane-dense batch (x8).
    # Padded weight/bias columns are zero, so padded hidden units stay exactly
    # 0 and never perturb the real ones; padded batch rows are sliced off.
    bs_p = _round_up(bs, 8)
    hid_p = _round_up(hid, 128)
    in_p = _round_up(in_sz, 8)

    if batch_splits is None:
        batch_splits = _default_batch_splits(ndir, bs_p)
    if batch_splits < 1 or bs_p % (8 * batch_splits):
        batch_splits = 1
    bs_c = bs_p // batch_splits

    # ---- Time-block size from a per-generation VMEM budget.
    x_bytes = jnp.dtype(x.dtype).itemsize
    w_bytes = jnp.dtype(mxu_dtype).itemsize
    try:
        vmem_cap = int(pltpu.get_tpu_info().vmem_capacity_bytes)
    except Exception:
        vmem_cap = 64 * 1024 * 1024   # conservative (v7x-sized)

    def _vmem_need(tb):
        blocks = 2 * tb * bs_c * (in_p + hid_p) * x_bytes          # x+out, 2x buffered
        weights = 2 * (in_p * hid_p + hid_p * hid_p) * w_bytes     # Wi+Wh, 2x buffered
        weights += 2 * (hid_p + bs_c * hid_p) * 4                  # B + h0, 2x buffered
        scratch = (tb + 1) * bs_c * hid_p * 4                      # pre + h carry
        return blocks + weights + scratch

    budget = int(0.45 * vmem_cap)
    t_blk = min(_round_up(seq, 8), 512)
    while t_blk > 8 and _vmem_need(t_blk) > budget:
        t_blk -= 8
    seq_p = _round_up(seq, t_blk)
    n_tblk = seq_p // t_blk
    has_time_pad = seq_p != seq
    unroll = 8
    assert t_blk % unroll == 0

    vmem_limit = int(min(int(0.9 * vmem_cap),
                         max(int(1.3 * _vmem_need(t_blk)) + (2 << 20),
                             32 << 20)))

    # ---- Parameters: stacked per direction, zero-padded, cast for the MXU.
    def pad2(w, r, c):
        w = w.astype(jnp.float32)
        return jnp.pad(w, ((0, r - w.shape[0]), (0, c - w.shape[1])))

    Wi_l, Wh_l, B_l = [params["Wi"]], [params["Wh"]], [params["B"]]
    if bidirection:
        Wi_l.append(params["Winvi"])
        Wh_l.append(params["Winvh"])
        B_l.append(params["Binv"])
    Wi = jnp.stack([pad2(w, in_p, hid_p) for w in Wi_l]).astype(mxu_dtype)
    Wh = jnp.stack([pad2(w, hid_p, hid_p) for w in Wh_l]).astype(mxu_dtype)
    B = jnp.stack([jnp.pad(b.astype(jnp.float32),
                           (0, hid_p - hid)).reshape(1, hid_p) for b in B_l])

    if init_states is None:
        h0 = jnp.zeros((ndir, bs_p, hid_p), jnp.float32)
    else:
        states = list(init_states) if bidirection else [init_states]
        h0 = jnp.stack([jnp.pad(s.astype(jnp.float32),
                                ((0, bs_p - bs), (0, hid_p - hid)))
                        for s in states])

    # x: pad, then go time-major so per-step accesses are full (8,128) vregs.
    xp = jnp.pad(x, ((0, bs_p - bs), (0, seq_p - seq), (0, in_p - in_sz)))
    xp = jnp.transpose(xp, (1, 0, 2))            # (seq_p, bs_p, in_p)

    def t_idx(d, g):          # forward: g ; reverse: n_tblk - 1 - g
        return g + d * (n_tblk - 1 - 2 * g)

    kernel = functools.partial(_rnn_block_kernel, tblk=t_blk, seq_len=seq,
                               has_time_pad=has_time_pad, unroll=unroll)

    out = pl.pallas_call(
        kernel,
        out_shape=jax.ShapeDtypeStruct((ndir, seq_p, bs_p, hid_p), out_dtype),
        grid_spec=pltpu.PrefetchScalarGridSpec(
            num_scalar_prefetch=0,
            grid=(ndir, batch_splits, n_tblk),
            in_specs=[
                pl.BlockSpec((t_blk, bs_c, in_p),
                             lambda d, b, g: (t_idx(d, g), b, 0)),
                pl.BlockSpec((None, bs_c, hid_p),
                             lambda d, b, g: (d, b, 0)),
                pl.BlockSpec((None, in_p, hid_p),
                             lambda d, b, g: (d, 0, 0)),
                pl.BlockSpec((None, hid_p, hid_p),
                             lambda d, b, g: (d, 0, 0)),
                pl.BlockSpec((None, 1, hid_p),
                             lambda d, b, g: (d, 0, 0)),
            ],
            out_specs=pl.BlockSpec((None, t_blk, bs_c, hid_p),
                                   lambda d, b, g: (d, t_idx(d, g), b, 0)),
            scratch_shapes=[
                pltpu.VMEM((t_blk, bs_c, hid_p), jnp.float32),   # pre
                pltpu.VMEM((bs_c, hid_p), jnp.float32),          # h carry
            ],
        ),
        compiler_params=pltpu.CompilerParams(
            # direction / batch-chunk axes are independent (megacore parts),
            # the time axis is the sequential recurrence.
            dimension_semantics=("parallel", "parallel", "arbitrary"),
            vmem_limit_bytes=vmem_limit),
    )(xp, h0, Wi, Wh, B)

    out = out[:, :seq, :bs, :hid]                # drop time/batch/hidden pads
    out = jnp.transpose(out, (0, 2, 1, 3))       # (ndir, bs, seq, hid)
    out_fwd = out[0]
    ht = out_fwd[:, -1, :]
    if not bidirection:
        return out_fwd, ht
    out_bwd = out[1]                             # already in natural time order
    hinvt = out_bwd[:, 0, :]                     # state after final reverse step
    return (jnp.concatenate([out_fwd, out_bwd], axis=2),
            jnp.concatenate([ht, hinvt], axis=1))


# --------------------------------------------------------------------------
# Parameter init + pure-JAX reference (mirrors the PyTorch loop)
# --------------------------------------------------------------------------
def init_params(key, input_size, hidden_size, bidirection=False,
                dtype=jnp.float32):
    std = 1.0 / math.sqrt(hidden_size)
    names = ["Wi", "Wh", "B"]
    shapes = [(input_size, hidden_size), (hidden_size, hidden_size),
              (hidden_size,)]
    if bidirection:
        names += ["Winvi", "Winvh", "Binv"]
        shapes += [(input_size, hidden_size), (hidden_size, hidden_size),
                   (hidden_size,)]
    keys = jax.random.split(key, len(names))
    return {n: jax.random.uniform(k, s, dtype, minval=-std, maxval=std)
            for n, s, k in zip(names, shapes, keys)}


def _reference_forward(x, params, bidirection=False):
    bs, seq, _ = x.shape
    hid = params["Wi"].shape[1]

    def run(Wi, Wh, B, xs):
        def step(h, xt):
            h = jnp.tanh(xt @ Wi + h @ Wh + B)
            return h, h
        h0 = jnp.zeros((bs, hid), x.dtype)
        _, outs = lax.scan(step, h0, xs)
        return outs                               # (seq, bs, hid)

    xs = jnp.transpose(x, (1, 0, 2))
    out_fwd = jnp.transpose(run(params["Wi"], params["Wh"], params["B"], xs),
                            (1, 0, 2))
    ht = out_fwd[:, -1, :]
    if not bidirection:
        return out_fwd, ht
    outs_b = run(params["Winvi"], params["Winvh"], params["Binv"], xs[::-1])
    out_bwd = jnp.transpose(outs_b[::-1], (1, 0, 2))
    return (jnp.concatenate([out_fwd, out_bwd], axis=2),
            jnp.concatenate([ht, out_bwd[:, 0, :]], axis=1))


# --------------------------------------------------------------------------
# Demo / verification
# --------------------------------------------------------------------------
if __name__ == "__main__":
    key = jax.random.PRNGKey(0)
    kx, kp, kx2, kp2 = jax.random.split(key, 4)

    # Case 1: unidirectional, exact f32 MXU path (module defaults).
    bs, seq, input_size, hidden_size = 2, 8, 16, 32
    x = jax.random.normal(kx, (bs, seq, input_size), jnp.float32)
    params_uni = init_params(kp, input_size, hidden_size, bidirection=False)
    out_u, ht_u = chaotic_rnn_forward(x, params_uni, bidirection=False,
                                      mxu_dtype=jnp.float32)
    out_u = jax.block_until_ready(out_u)
    ref_out_u, ref_ht_u = _reference_forward(x, params_uni, bidirection=False)
    assert out_u.shape == (bs, seq, hidden_size)
    assert jnp.allclose(out_u, ref_out_u, atol=1e-5)
    assert jnp.allclose(ht_u, ref_ht_u, atol=1e-5)

    # Case 2: bidirectional, exact f32 MXU path.
    params_bi = init_params(kp, input_size, hidden_size, bidirection=True)
    out_b, ht_b = chaotic_rnn_forward(x, params_bi, bidirection=True,
                                      mxu_dtype=jnp.float32)
    out_b = jax.block_until_ready(out_b)
    ref_out_b, ref_ht_b = _reference_forward(x, params_bi, bidirection=True)
    assert out_b.shape == (bs, seq, 2 * hidden_size)
    assert ht_b.shape == (bs, 2 * hidden_size)
    assert jnp.allclose(out_b, ref_out_b, atol=1e-5)
    assert jnp.allclose(ht_b, ref_ht_b, atol=1e-5)

    # Case 3: awkward shapes (batch/time/hidden padding + reverse-tail mask).
    bs3, seq3, in3, hid3 = 3, 11, 10, 48
    x3 = jax.random.normal(kx2, (bs3, seq3, in3), jnp.float32)
    params3 = init_params(kp2, in3, hid3, bidirection=True)
    out3, ht3 = chaotic_rnn_forward(x3, params3, bidirection=True,
                                    mxu_dtype=jnp.float32)
    out3 = jax.block_until_ready(out3)
    ref_out3, ref_ht3 = _reference_forward(x3, params3, bidirection=True)
    assert out3.shape == (bs3, seq3, 2 * hid3)
    assert jnp.allclose(out3, ref_out3, atol=1e-5)
    assert jnp.allclose(ht3, ref_ht3, atol=1e-5)

    # Case 4: bf16-weight MXU path (default on v6e / v7x), loose tolerance.
    out_bf, ht_bf = chaotic_rnn_forward(x, params_uni, bidirection=False,
                                        mxu_dtype=jnp.bfloat16)
    out_bf = jax.block_until_ready(out_bf)
    assert jnp.allclose(out_bf, ref_out_u, atol=5e-2)
    assert jnp.allclose(ht_bf, ref_ht_u, atol=5e-2)

    print("KERNEL_OK")
</pallas_src>

<mosaic_0001>
module attributes {stable_mosaic.version = 11 : i64} {
  func.func @_rnn_block_kernel(%arg0: i32, %arg1: i32, %arg2: i32, %arg3: memref<8x8x16xf32, #tpu.memory_space<vmem>>, %arg4: memref<1x8x128xf32, #tpu.memory_space<vmem>>, %arg5: memref<1x16x128xf32, #tpu.memory_space<vmem>>, %arg6: memref<1x128x128xf32, #tpu.memory_space<vmem>>, %arg7: memref<1x1x128xf32, #tpu.memory_space<vmem>>, %arg8: memref<1x8x8x128xf32, #tpu.memory_space<vmem>>, %arg9: memref<8x8x128xf32, #tpu.memory_space<vmem>>, %arg10: memref<8x128xf32, #tpu.memory_space<vmem>>) attributes {dimension_semantics = [#tpu.dimension_semantics<parallel>, #tpu.dimension_semantics<parallel>, #tpu.dimension_semantics<arbitrary>], iteration_bounds = array<i64: 1, 1, 1>, scalar_prefetch = 0 : i64, scratch_operands = 2 : i64, tpu.core_type = #tpu.core_type<tc>, window_params = [{transform_indices = @transform_0, window_bounds = array<i64: 8, 8, 16>}, {transform_indices = @transform_1, window_bounds = array<i64: 1, 8, 128>}, {transform_indices = @transform_2, window_bounds = array<i64: 1, 16, 128>}, {transform_indices = @transform_3, window_bounds = array<i64: 1, 128, 128>}, {transform_indices = @transform_4, window_bounds = array<i64: 1, 1, 128>}, {transform_indices = @transform_5, window_bounds = array<i64: 1, 8, 8, 128>}]} {
    %c0_i32 = arith.constant 0 : i32
    %0 = arith.cmpi eq, %arg2, %c0_i32 : i32
    %1 = arith.extui %0 : i1 to i32
    %c0_i32_0 = arith.constant 0 : i32
    %2 = arith.cmpi ne, %1, %c0_i32_0 : i32
    scf.if %2 {
      %c0_94 = arith.constant 0 : index
      %c0_95 = arith.constant 0 : index
      %c0_96 = arith.constant 0 : index
      %147 = vector.load %arg4[%c0_94, %c0_95, %c0_96] : memref<1x8x128xf32, #tpu.memory_space<vmem>>, vector<1x8x128xf32>
      %148 = vector.shape_cast %147 : vector<1x8x128xf32> to vector<8x128xf32>
      %c0_97 = arith.constant 0 : index
      %c0_98 = arith.constant 0 : index
      %149 = vector.load %arg10[%c0_97, %c0_98] : memref<8x128xf32, #tpu.memory_space<vmem>>, vector<8x128xf32>
      tpu.vector_store %arg10[%c0_97, %c0_98], %148 {strides = array<i32>} : memref<8x128xf32, #tpu.memory_space<vmem>>, vector<8x128xf32>,
    } else {
    }
    %c0 = arith.constant 0 : index
    %c0_1 = arith.constant 0 : index
    %c0_2 = arith.constant 0 : index
    %3 = vector.load %arg3[%c0, %c0_1, %c0_2] : memref<8x8x16xf32, #tpu.memory_space<vmem>>, vector<8x8x16xf32>
    %4 = vector.shape_cast %3 : vector<8x8x16xf32> to vector<64x16xf32>
    %c0_3 = arith.constant 0 : index
    %c0_4 = arith.constant 0 : index
    %c0_5 = arith.constant 0 : index
    %5 = vector.load %arg5[%c0_3, %c0_4, %c0_5] : memref<1x16x128xf32, #tpu.memory_space<vmem>>, vector<1x16x128xf32>
    %6 = vector.shape_cast %5 : vector<1x16x128xf32> to vector<16x128xf32>
    %cst = arith.constant dense<0.000000e+00> : vector<64x128xf32>
    %7 = tpu.matmul %4, %6, %cst {dimension_numbers = #tpu.dot_dimension_numbers<[1], [0], [0], [1], [0, 0, 1, 1], [], []>} : vector<64x16xf32>, vector<16x128xf32>, vector<64x128xf32> -> vector<64x128xf32>
    %c0_6 = arith.constant 0 : index
    %c0_7 = arith.constant 0 : index
    %c0_8 = arith.constant 0 : index
    %8 = vector.load %arg7[%c0_6, %c0_7, %c0_8] : memref<1x1x128xf32, #tpu.memory_space<vmem>>, vector<1x1x128xf32>
    %9 = vector.shape_cast %8 : vector<1x1x128xf32> to vector<1x128xf32>
    %10 = vector.broadcast %9 : vector<1x128xf32> to vector<64x128xf32>
    %11 = arith.addf %7, %10 : vector<64x128xf32>
    %12 = vector.shape_cast %11 : vector<64x128xf32> to vector<8x8x128xf32>
    %c0_9 = arith.constant 0 : index
    %c0_10 = arith.constant 0 : index
    %c0_11 = arith.constant 0 : index
    %13 = vector.load %arg9[%c0_9, %c0_10, %c0_11] : memref<8x8x128xf32, #tpu.memory_space<vmem>>, vector<8x8x128xf32>
    tpu.vector_store %arg9[%c0_9, %c0_10, %c0_11], %12 {strides = array<i32>} : memref<8x8x128xf32, #tpu.memory_space<vmem>>, vector<8x8x128xf32>,
    %c0_12 = arith.constant 0 : index
    %c0_13 = arith.constant 0 : index
    %c0_14 = arith.constant 0 : index
    %14 = vector.load %arg6[%c0_12, %c0_13, %c0_14] : memref<1x128x128xf32, #tpu.memory_space<vmem>>, vector<1x128x128xf32>
    %15 = vector.shape_cast %14 : vector<1x128x128xf32> to vector<128x128xf32>
    %c0_15 = arith.constant 0 : index
    %c0_16 = arith.constant 0 : index
    %16 = vector.load %arg10[%c0_15, %c0_16] : memref<8x128xf32, #tpu.memory_space<vmem>>, vector<8x128xf32>
    %c0_i32_17 = arith.constant 0 : i32
    %c8_i32 = arith.constant 8 : i32
    %17 = arith.muli %c0_i32_17, %c8_i32 : i32
    %c0_i32_18 = arith.constant 0 : i32
    %18 = arith.addi %17, %c0_i32_18 : i32
    %c7_i32 = arith.constant 7 : i32
    %19 = arith.muli %arg0, %c7_i32 : i32
    %c2_i32 = arith.constant 2 : i32
    %20 = arith.muli %c2_i32, %arg0 : i32
    %c1_i32 = arith.constant 1 : i32
    %21 = arith.subi %c1_i32, %20 : i32
    %22 = arith.muli %21, %18 : i32
    %23 = arith.addi %19, %22 : i32
    %24 = arith.index_cast %23 : i32 to index
    %c0_19 = arith.constant 0 : index
    %c0_20 = arith.constant 0 : index
    %25 = vector.load %arg9[%24, %c0_19, %c0_20] : memref<8x8x128xf32, #tpu.memory_space<vmem>>, vector<1x8x128xf32>
    %26 = vector.shape_cast %25 : vector<1x8x128xf32> to vector<8x128xf32>
    %cst_21 = arith.constant dense<0.000000e+00> : vector<8x128xf32>
    %27 = tpu.matmul %16, %15, %cst_21 {dimension_numbers = #tpu.dot_dimension_numbers<[1], [0], [0], [1], [0, 0, 1, 1], [], []>} : vector<8x128xf32>, vector<128x128xf32>, vector<8x128xf32> -> vector<8x128xf32>
    %28 = arith.addf %26, %27 : vector<8x128xf32>
    %29 = math.tanh %28 : vector<8x128xf32>
    %c0_22 = arith.constant 0 : index
    %30 = arith.index_cast %23 : i32 to index
    %c0_23 = arith.constant 0 : index
    %c0_24 = arith.constant 0 : index
    %31 = vector.load %arg8[%c0_22, %30, %c0_23, %c0_24] : memref<1x8x8x128xf32, #tpu.memory_space<vmem>>, vector<1x1x8x128xf32>
    %32 = vector.shape_cast %31 : vector<1x1x8x128xf32> to vector<8x128xf32>
    %33 = vector.shape_cast %29 : vector<8x128xf32> to vector<1x1x8x128xf32>
    tpu.vector_store %arg8[%c0_22, %30, %c0_23, %c0_24], %33 {strides = array<i32>} : memref<1x8x8x128xf32, #tpu.memory_space<vmem>>, vector<1x1x8x128xf32>,
    %c1_i32_25 = arith.constant 1 : i32
    %34 = arith.addi %17, %c1_i32_25 : i32
    %c7_i32_26 = arith.constant 7 : i32
    %35 = arith.muli %arg0, %c7_i32_26 : i32
    %c2_i32_27 = arith.constant 2 : i32
    %36 = arith.muli %c2_i32_27, %arg0 : i32
    %c1_i32_28 = arith.constant 1 : i32
    %37 = arith.subi %c1_i32_28, %36 : i32
    %38 = arith.muli %37, %34 : i32
    %39 = arith.addi %35, %38 : i32
    %40 = arith.index_cast %39 : i32 to index
    %c0_29 = arith.constant 0 : index
    %c0_30 = arith.constant 0 : index
    %41 = vector.load %arg9[%40, %c0_29, %c0_30] : memref<8x8x128xf32, #tpu.memory_space<vmem>>, vector<1x8x128xf32>
    %42 = vector.shape_cast %41 : vector<1x8x128xf32> to vector<8x128xf32>
    %cst_31 = arith.constant dense<0.000000e+00> : vector<8x128xf32>
    %43 = tpu.matmul %29, %15, %cst_31 {dimension_numbers = #tpu.dot_dimension_numbers<[1], [0], [0], [1], [0, 0, 1, 1], [], []>} : vector<8x128xf32>, vector<128x128xf32>, vector<8x128xf32> -> vector<8x128xf32>
    %44 = arith.addf %42, %43 : vector<8x128xf32>
    %45 = math.tanh %44 : vector<8x128xf32>
    %c0_32 = arith.constant 0 : index
    %46 = arith.index_cast %39 : i32 to index
    %c0_33 = arith.constant 0 : index
    %c0_34 = arith.constant 0 : index
    %47 = vector.load %arg8[%c0_32, %46, %c0_33, %c0_34] : memref<1x8x8x128xf32, #tpu.memory_space<vmem>>, vector<1x1x8x128xf32>
    %48 = vector.shape_cast %47 : vector<1x1x8x128xf32> to vector<8x128xf32>
    %49 = vector.shape_cast %45 : vector<8x128xf32> to vector<1x1x8x128xf32>
    tpu.vector_store %arg8[%c0_32, %46, %c0_33, %c0_34], %49 {strides = array<i32>} : memref<1x8x8x128xf32, #tpu.memory_space<vmem>>, vector<1x1x8x128xf32>,
    %c2_i32_35 = arith.constant 2 : i32
    %50 = arith.addi %17, %c2_i32_35 : i32
    %c7_i32_36 = arith.constant 7 : i32
    %51 = arith.muli %arg0, %c7_i32_36 : i32
    %c2_i32_37 = arith.constant 2 : i32
    %52 = arith.muli %c2_i32_37, %arg0 : i32
    %c1_i32_38 = arith.constant 1 : i32
    %53 = arith.subi %c1_i32_38, %52 : i32
    %54 = arith.muli %53, %50 : i32
    %55 = arith.addi %51, %54 : i32
    %56 = arith.index_cast %55 : i32 to index
    %c0_39 = arith.constant 0 : index
    %c0_40 = arith.constant 0 : index
    %57 = vector.load %arg9[%56, %c0_39, %c0_40] : memref<8x8x128xf32, #tpu.memory_space<vmem>>, vector<1x8x128xf32>
    %58 = vector.shape_cast %57 : vector<1x8x128xf32> to vector<8x128xf32>
    %cst_41 = arith.constant dense<0.000000e+00> : vector<8x128xf32>
    %59 = tpu.matmul %45, %15, %cst_41 {dimension_numbers = #tpu.dot_dimension_numbers<[1], [0], [0], [1], [0, 0, 1, 1], [], []>} : vector<8x128xf32>, vector<128x128xf32>, vector<8x128xf32> -> vector<8x128xf32>
    %60 = arith.addf %58, %59 : vector<8x128xf32>
    %61 = math.tanh %60 : vector<8x128xf32>
    %c0_42 = arith.constant 0 : index
    %62 = arith.index_cast %55 : i32 to index
    %c0_43 = arith.constant 0 : index
    %c0_44 = arith.constant 0 : index
    %63 = vector.load %arg8[%c0_42, %62, %c0_43, %c0_44] : memref<1x8x8x128xf32, #tpu.memory_space<vmem>>, vector<1x1x8x128xf32>
    %64 = vector.shape_cast %63 : vector<1x1x8x128xf32> to vector<8x128xf32>
    %65 = vector.shape_cast %61 : vector<8x128xf32> to vector<1x1x8x128xf32>
    tpu.vector_store %arg8[%c0_42, %62, %c0_43, %c0_44], %65 {strides = array<i32>} : memref<1x8x8x128xf32, #tpu.memory_space<vmem>>, vector<1x1x8x128xf32>,
    %c3_i32 = arith.constant 3 : i32
    %66 = arith.addi %17, %c3_i32 : i32
    %c7_i32_45 = arith.constant 7 : i32
    %67 = arith.muli %arg0, %c7_i32_45 : i32
    %c2_i32_46 = arith.constant 2 : i32
    %68 = arith.muli %c2_i32_46, %arg0 : i32
    %c1_i32_47 = arith.constant 1 : i32
    %69 = arith.subi %c1_i32_47, %68 : i32
    %70 = arith.muli %69, %66 : i32
    %71 = arith.addi %67, %70 : i32
    %72 = arith.index_cast %71 : i32 to index
    %c0_48 = arith.constant 0 : index
    %c0_49 = arith.constant 0 : index
    %73 = vector.load %arg9[%72, %c0_48, %c0_49] : memref<8x8x128xf32, #tpu.memory_space<vmem>>, vector<1x8x128xf32>
    %74 = vector.shape_cast %73 : vector<1x8x128xf32> to vector<8x128xf32>
    %cst_50 = arith.constant dense<0.000000e+00> : vector<8x128xf32>
    %75 = tpu.matmul %61, %15, %cst_50 {dimension_numbers = #tpu.dot_dimension_numbers<[1], [0], [0], [1], [0, 0, 1, 1], [], []>} : vector<8x128xf32>, vector<128x128xf32>, vector<8x128xf32> -> vector<8x128xf32>
    %76 = arith.addf %74, %75 : vector<8x128xf32>
    %77 = math.tanh %76 : vector<8x128xf32>
    %c0_51 = arith.constant 0 : index
    %78 = arith.index_cast %71 : i32 to index
    %c0_52 = arith.constant 0 : index
    %c0_53 = arith.constant 0 : index
    %79 = vector.load %arg8[%c0_51, %78, %c0_52, %c0_53] : memref<1x8x8x128xf32, #tpu.memory_space<vmem>>, vector<1x1x8x128xf32>
    %80 = vector.shape_cast %79 : vector<1x1x8x128xf32> to vector<8x128xf32>
    %81 = vector.shape_cast %77 : vector<8x128xf32> to vector<1x1x8x128xf32>
    tpu.vector_store %arg8[%c0_51, %78, %c0_52, %c0_53], %81 {strides = array<i32>} : memref<1x8x8x128xf32, #tpu.memory_space<vmem>>, vector<1x1x8x128xf32>,
    %c4_i32 = arith.constant 4 : i32
    %82 = arith.addi %17, %c4_i32 : i32
    %c7_i32_54 = arith.constant 7 : i32
    %83 = arith.muli %arg0, %c7_i32_54 : i32
    %c2_i32_55 = arith.constant 2 : i32
    %84 = arith.muli %c2_i32_55, %arg0 : i32
    %c1_i32_56 = arith.constant 1 : i32
    %85 = arith.subi %c1_i32_56, %84 : i32
    %86 = arith.muli %85, %82 : i32
    %87 = arith.addi %83, %86 : i32
    %88 = arith.index_cast %87 : i32 to index
    %c0_57 = arith.constant 0 : index
    %c0_58 = arith.constant 0 : index
    %89 = vector.load %arg9[%88, %c0_57, %c0_58] : memref<8x8x128xf32, #tpu.memory_space<vmem>>, vector<1x8x128xf32>
    %90 = vector.shape_cast %89 : vector<1x8x128xf32> to vector<8x128xf32>
    %cst_59 = arith.constant dense<0.000000e+00> : vector<8x128xf32>
    %91 = tpu.matmul %77, %15, %cst_59 {dimension_numbers = #tpu.dot_dimension_numbers<[1], [0], [0], [1], [0, 0, 1, 1], [], []>} : vector<8x128xf32>, vector<128x128xf32>, vector<8x128xf32> -> vector<8x128xf32>
    %92 = arith.addf %90, %91 : vector<8x128xf32>
    %93 = math.tanh %92 : vector<8x128xf32>
    %c0_60 = arith.constant 0 : index
    %94 = arith.index_cast %87 : i32 to index
    %c0_61 = arith.constant 0 : index
    %c0_62 = arith.constant 0 : index
    %95 = vector.load %arg8[%c0_60, %94, %c0_61, %c0_62] : memref<1x8x8x128xf32, #tpu.memory_space<vmem>>, vector<1x1x8x128xf32>
    %96 = vector.shape_cast %95 : vector<1x1x8x128xf32> to vector<8x128xf32>
    %97 = vector.shape_cast %93 : vector<8x128xf32> to vector<1x1x8x128xf32>
    tpu.vector_store %arg8[%c0_60, %94, %c0_61, %c0_62], %97 {strides = array<i32>} : memref<1x8x8x128xf32, #tpu.memory_space<vmem>>, vector<1x1x8x128xf32>,
    %c5_i32 = arith.constant 5 : i32
    %98 = arith.addi %17, %c5_i32 : i32
    %c7_i32_63 = arith.constant 7 : i32
    %99 = arith.muli %arg0, %c7_i32_63 : i32
    %c2_i32_64 = arith.constant 2 : i32
    %100 = arith.muli %c2_i32_64, %arg0 : i32
    %c1_i32_65 = arith.constant 1 : i32
    %101 = arith.subi %c1_i32_65, %100 : i32
    %102 = arith.muli %101, %98 : i32
    %103 = arith.addi %99, %102 : i32
    %104 = arith.index_cast %103 : i32 to index
    %c0_66 = arith.constant 0 : index
    %c0_67 = arith.constant 0 : index
    %105 = vector.load %arg9[%104, %c0_66, %c0_67] : memref<8x8x128xf32, #tpu.memory_space<vmem>>, vector<1x8x128xf32>
    %106 = vector.shape_cast %105 : vector<1x8x128xf32> to vector<8x128xf32>
    %cst_68 = arith.constant dense<0.000000e+00> : vector<8x128xf32>
    %107 = tpu.matmul %93, %15, %cst_68 {dimension_numbers = #tpu.dot_dimension_numbers<[1], [0], [0], [1], [0, 0, 1, 1], [], []>} : vector<8x128xf32>, vector<128x128xf32>, vector<8x128xf32> -> vector<8x128xf32>
    %108 = arith.addf %106, %107 : vector<8x128xf32>
    %109 = math.tanh %108 : vector<8x128xf32>
    %c0_69 = arith.constant 0 : index
    %110 = arith.index_cast %103 : i32 to index
    %c0_70 = arith.constant 0 : index
    %c0_71 = arith.constant 0 : index
    %111 = vector.load %arg8[%c0_69, %110, %c0_70, %c0_71] : memref<1x8x8x128xf32, #tpu.memory_space<vmem>>, vector<1x1x8x128xf32>
    %112 = vector.shape_cast %111 : vector<1x1x8x128xf32> to vector<8x128xf32>
    %113 = vector.shape_cast %109 : vector<8x128xf32> to vector<1x1x8x128xf32>
    tpu.vector_store %arg8[%c0_69, %110, %c0_70, %c0_71], %113 {strides = array<i32>} : memref<1x8x8x128xf32, #tpu.memory_space<vmem>>, vector<1x1x8x128xf32>,
    %c6_i32 = arith.constant 6 : i32
    %114 = arith.addi %17, %c6_i32 : i32
    %c7_i32_72 = arith.constant 7 : i32
    %115 = arith.muli %arg0, %c7_i32_72 : i32
    %c2_i32_73 = arith.constant 2 : i32
    %116 = arith.muli %c2_i32_73, %arg0 : i32
    %c1_i32_74 = arith.constant 1 : i32
    %117 = arith.subi %c1_i32_74, %116 : i32
    %118 = arith.muli %117, %114 : i32
    %119 = arith.addi %115, %118 : i32
    %120 = arith.index_cast %119 : i32 to index
    %c0_75 = arith.constant 0 : index
    %c0_76 = arith.constant 0 : index
    %121 = vector.load %arg9[%120, %c0_75, %c0_76] : memref<8x8x128xf32, #tpu.memory_space<vmem>>, vector<1x8x128xf32>
    %122 = vector.shape_cast %121 : vector<1x8x128xf32> to vector<8x128xf32>
    %cst_77 = arith.constant dense<0.000000e+00> : vector<8x128xf32>
    %123 = tpu.matmul %109, %15, %cst_77 {dimension_numbers = #tpu.dot_dimension_numbers<[1], [0], [0], [1], [0, 0, 1, 1], [], []>} : vector<8x128xf32>, vector<128x128xf32>, vector<8x128xf32> -> vector<8x128xf32>
    %124 = arith.addf %122, %123 : vector<8x128xf32>
    %125 = math.tanh %124 : vector<8x128xf32>
    %c0_78 = arith.constant 0 : index
    %126 = arith.index_cast %119 : i32 to index
    %c0_79 = arith.constant 0 : index
    %c0_80 = arith.constant 0 : index
    %127 = vector.load %arg8[%c0_78, %126, %c0_79, %c0_80] : memref<1x8x8x128xf32, #tpu.memory_space<vmem>>, vector<1x1x8x128xf32>
    %128 = vector.shape_cast %127 : vector<1x1x8x128xf32> to vector<8x128xf32>
    %129 = vector.shape_cast %125 : vector<8x128xf32> to vector<1x1x8x128xf32>
    tpu.vector_store %arg8[%c0_78, %126, %c0_79, %c0_80], %129 {strides = array<i32>} : memref<1x8x8x128xf32, #tpu.memory_space<vmem>>, vector<1x1x8x128xf32>,
    %c7_i32_81 = arith.constant 7 : i32
    %130 = arith.addi %17, %c7_i32_81 : i32
    %c7_i32_82 = arith.constant 7 : i32
    %131 = arith.muli %arg0, %c7_i32_82 : i32
    %c2_i32_83 = arith.constant 2 : i32
    %132 = arith.muli %c2_i32_83, %arg0 : i32
    %c1_i32_84 = arith.constant 1 : i32
    %133 = arith.subi %c1_i32_84, %132 : i32
    %134 = arith.muli %133, %130 : i32
    %135 = arith.addi %131, %134 : i32
    %136 = arith.index_cast %135 : i32 to index
    %c0_85 = arith.constant 0 : index
    %c0_86 = arith.constant 0 : index
    %137 = vector.load %arg9[%136, %c0_85, %c0_86] : memref<8x8x128xf32, #tpu.memory_space<vmem>>, vector<1x8x128xf32>
    %138 = vector.shape_cast %137 : vector<1x8x128xf32> to vector<8x128xf32>
    %cst_87 = arith.constant dense<0.000000e+00> : vector<8x128xf32>
    %139 = tpu.matmul %125, %15, %cst_87 {dimension_numbers = #tpu.dot_dimension_numbers<[1], [0], [0], [1], [0, 0, 1, 1], [], []>} : vector<8x128xf32>, vector<128x128xf32>, vector<8x128xf32> -> vector<8x128xf32>
    %140 = arith.addf %138, %139 : vector<8x128xf32>
    %141 = math.tanh %140 : vector<8x128xf32>
    %c0_88 = arith.constant 0 : index
    %142 = arith.index_cast %135 : i32 to index
    %c0_89 = arith.constant 0 : index
    %c0_90 = arith.constant 0 : index
    %143 = vector.load %arg8[%c0_88, %142, %c0_89, %c0_90] : memref<1x8x8x128xf32, #tpu.memory_space<vmem>>, vector<1x1x8x128xf32>
    %144 = vector.shape_cast %143 : vector<1x1x8x128xf32> to vector<8x128xf32>
    %145 = vector.shape_cast %141 : vector<8x128xf32> to vector<1x1x8x128xf32>
    tpu.vector_store %arg8[%c0_88, %142, %c0_89, %c0_90], %145 {strides = array<i32>} : memref<1x8x8x128xf32, #tpu.memory_space<vmem>>, vector<1x1x8x128xf32>,
    %c1_i32_91 = arith.constant 1 : i32
    %c0_92 = arith.constant 0 : index
    %c0_93 = arith.constant 0 : index
    %146 = vector.load %arg10[%c0_92, %c0_93] : memref<8x128xf32, #tpu.memory_space<vmem>>, vector<8x128xf32>
    tpu.vector_store %arg10[%c0_92, %c0_93], %141 {strides = array<i32>} : memref<8x128xf32, #tpu.memory_space<vmem>>, vector<8x128xf32>,
    return
  }
  func.func @transform_0(%arg0: i32, %arg1: i32, %arg2: i32) -> (i32, i32, i32) {
    %c2_i32 = arith.constant 2 : i32
    %0 = arith.muli %c2_i32, %arg2 : i32
    %c0_i32 = arith.constant 0 : i32
    %1 = arith.subi %c0_i32, %0 : i32
    %2 = arith.muli %arg0, %1 : i32
    %3 = arith.addi %arg2, %2 : i32
    %c0_i32_0 = arith.constant 0 : i32
    %c0_i32_1 = arith.constant 0 : i32
    return %3, %arg1, %c0_i32_0 : i32, i32, i32
  }
  func.func @transform_1(%arg0: i32, %arg1: i32, %arg2: i32) -> (i32, i32, i32) {
    %c0_i32 = arith.constant 0 : i32
    %c0_i32_0 = arith.constant 0 : i32
    return %arg0, %arg1, %c0_i32 : i32, i32, i32
  }
  func.func @transform_2(%arg0: i32, %arg1: i32, %arg2: i32) -> (i32, i32, i32) {
    %c0_i32 = arith.constant 0 : i32
    %c0_i32_0 = arith.constant 0 : i32
    %c0_i32_1 = arith.constant 0 : i32
    return %arg0, %c0_i32, %c0_i32_0 : i32, i32, i32
  }
  func.func @transform_3(%arg0: i32, %arg1: i32, %arg2: i32) -> (i32, i32, i32) {
    %c0_i32 = arith.constant 0 : i32
    %c0_i32_0 = arith.constant 0 : i32
    %c0_i32_1 = arith.constant 0 : i32
    return %arg0, %c0_i32, %c0_i32_0 : i32, i32, i32
  }
  func.func @transform_4(%arg0: i32, %arg1: i32, %arg2: i32) -> (i32, i32, i32) {
    %c0_i32 = arith.constant 0 : i32
    %c0_i32_0 = arith.constant 0 : i32
    %c0_i32_1 = arith.constant 0 : i32
    return %arg0, %c0_i32, %c0_i32_0 : i32, i32, i32
  }
  func.func @transform_5(%arg0: i32, %arg1: i32, %arg2: i32) -> (i32, i32, i32, i32) {
    %c2_i32 = arith.constant 2 : i32
    %0 = arith.muli %c2_i32, %arg2 : i32
    %c0_i32 = arith.constant 0 : i32
    %1 = arith.subi %c0_i32, %0 : i32
    %2 = arith.muli %arg0, %1 : i32
    %3 = arith.addi %arg2, %2 : i32
    %c0_i32_0 = arith.constant 0 : i32
    %c0_i32_1 = arith.constant 0 : i32
    return %arg0, %3, %arg1, %c0_i32_0 : i32, i32, i32, i32
  }
}

</mosaic_0001>

<bundles_post_ra>
// kernel: tpu_custom_call.1
= control target key start
LH: loop header
LB: loop body
LE: loop exit
PB: predicated region body
PF: predicated region fallthrough
CT: control target
= control target key end

     0   :  { %10 = vsyncpa [#allocation5], 0  ;;  %s922_s0 = inlined_call_operand.hbm [shape: f32[8,8,16], index: 0, kind: input, shape index: {}]   ;;  %s923_s1 = inlined_call_operand.hbm [shape: f32[1,8,128], index: 1, kind: input, shape index: {}]   ;;  %s924_s2 = inlined_call_operand.hbm [shape: f32[1,16,128], index: 2, kind: input, shape index: {}]   ;;  %s925_s3 = inlined_call_operand.hbm [shape: f32[1,128,128], index: 3, kind: input, shape index: {}]   ;;  %s926_s4 = inlined_call_operand.vmem [shape: f32[1,1,128], index: 4, kind: input, shape index: {}]   ;;  %s927_s5 = inlined_call_operand.hbm [shape: f32[1,8,8,128], index: 5, kind: output, shape index: {}]  }
   0x1   :  { %11 = vsyncpa [#allocation8], 0 }
   0x2   :  { %12 = vsyncpa [#allocation11], 0  ;;  %s39_s20 = sshll.u32 %s923_s1, 4  ;;  %s40_s20 = int_to_ptr.hbm [resolvable:$true] %s39_s20 }
   0x3   :  { %13 = vsyncpa [#allocation6], 0  ;;  %s677_s21 = smov [#allocation7]   ;;  %s25_s25 = sshll.u32 %s922_s0, 4  ;;  %s26_s25 = int_to_ptr.hbm [resolvable:$true] %s25_s25 }
   0x4   :  { %s41_s22 = sshll.u32 %s677_s21, 4  ;;  %s678_s26 = smov [#allocation4]   ;;  %s42_s22 = int_to_ptr.vmem [resolvable:$true] %s41_s22 }
   0x5   :  { %44 = dma.hbm_to_vmem [thread:$0]  %s40_s20, 128, %s42_s22, [#allocation8]  }
   0x6   :  { %s27_s27 = sshll.u32 %s678_s26, 4  ;;  %s679_s28 = smov 128   ;;  %s28_s27 = int_to_ptr.vmem [resolvable:$true] %s27_s27 }
   0x7   :  { %s680_s29 = smov 8   ;;  %s49_s6 = sshll.u32 %s924_s2, 4  ;;  %s50_s6 = int_to_ptr.hbm [resolvable:$true] %s49_s6 }
   0x8   :  { %33 = dma.hbm_to_vmem [thread:$0]  %s26_s25, 1024, %s28_s27, [#allocation5], %s679_s28, %s679_s28, %s680_s29  }
   0x9   :  { %s681_s7 = smov [#allocation9]   ;;  %s62_s10 = sshll.u32 %s925_s3, 4  ;;  %s63_s10 = int_to_ptr.hbm [resolvable:$true] %s62_s10 }
   0xa   :  { %s51_s8 = sshll.u32 %s681_s7, 4  ;;  %s682_s11 = smov [#allocation10]   ;;  %s52_s8 = int_to_ptr.vmem [resolvable:$true] %s51_s8 }
   0xb   :  { %57 = dma.hbm_to_vmem [thread:$0]  %s50_s6, 256, %s52_s8, [#allocation8], %s679_s28, %s679_s28, %s680_s29  }
   0xc   :  { %s64_s12 = sshll.u32 %s682_s11, 4  ;;  %s65_s12 = int_to_ptr.vmem [resolvable:$true] %s64_s12 }
   0xd   :  { %70 = dma.hbm_to_vmem [thread:$0]  %s63_s10, 2048, %s65_s12, [#allocation11], %s679_s28, %s679_s28, %s680_s29  }
   0xe   :  { %669 = dma.done.wait [#allocation5], 1024  }
   0xf   :  { %670 = vsyncadd [#allocation5], 4294966272 }
  0x10   :  { %671 = dma.done.wait [#allocation8], 384  }
  0x11   :  { %672 = vsyncadd [#allocation8], 4294966912 }
  0x12   :  { %673 = dma.done.wait [#allocation11], 2048  }
  0x13   :  { %674 = vsyncadd [#allocation11], 4294965248  ;;  %v735_v0 = vld [vmem:[#allocation10 + $0x78] sm:$0xff]  ;;  %v737_v1 = vld [vmem:[#allocation10 + $0x70] sm:$0xff]  ;;  %vm119_vm0 = vcmask 130048   ;;  %s456_s16 = sshll.u32 %s927_s5, 4  ;;  %s457_s16 = int_to_ptr.hbm [resolvable:$true] %s456_s16 }
  0x14   :  { %214 = vmatpush.msra.mxu1 %v735_v0  ;;  %244 = vmatpush.msra.mxu2 %v735_v0  ;;  %v741_v2 = vld [vmem:[#allocation10 + $0x68] sm:$0xff]  ;;  %v746_v3 = vld [vmem:[#allocation10 + $0x60] sm:$0xff]  ;;  %v114_v4 = vld [vmem:[#allocation9 + $0x8] sm:$0xff] }
  0x15   :  { %273 = vmatpush.msra.mxu3 %v735_v0  ;;  %158 = vmatpush.msra.mxu0 %v114_v4  ;;  %v113_v5 = vld [vmem:[#allocation9] sm:$0xff]  ;;  %v105_v6 = vld [vmem:[#allocation4] sm:$0xff]  ;;  %v750_v7 = vld [vmem:[#allocation10 + $0x58] sm:$0xff] }
  0x16   :  { %215 = vmatpush.msra.mxu1 %v737_v1  ;;  %245 = vmatpush.msra.mxu2 %v737_v1  ;;  %v755_v8 = vld [vmem:[#allocation10 + $0x50] sm:$0xff]  ;;  %v761_v9 = vld [vmem:[#allocation10 + $0x48] sm:$0xff]  ;;  %v767_v10 = vld [vmem:[#allocation10 + $0x40] sm:$0xff] }
  0x17   :  { %274 = vmatpush.msra.mxu3 %v737_v1  ;;  %159 = vmatpush.msra.mxu0 %v113_v5  ;;  %v773_v11 = vld [vmem:[#allocation10 + $0x38] sm:$0xff]  ;;  %v779_v12 = vld [vmem:[#allocation10 + $0x30] sm:$0xff]  ;;  %v785_v13 = vld [vmem:[#allocation10 + $0x28] sm:$0xff] }
  0x18   :  { %216 = vmatpush.msra.mxu1 %v741_v2  ;;  %246 = vmatpush.msra.mxu2 %v741_v2  ;;  %v791_v14 = vld [vmem:[#allocation10 + $0x20] sm:$0xff]  ;;  %v797_v15 = vld [vmem:[#allocation10 + $0x18] sm:$0xff]  ;;  %v803_v16 = vld [vmem:[#allocation10 + $0x10] sm:$0xff] }
  0x19   :  { %275 = vmatpush.msra.mxu3 %v741_v2  ;;  %517 = vmatmul.msk.f32.vlgmr.msra.gmra.mxu0 %vm119_vm0, %v105_v6  ;;  %v809_v17 = vld [vmem:[#allocation10 + $0x8] sm:$0xff]  ;;  %v815_v18 = vld [vmem:[#allocation10] sm:$0xff]  ;;  %v106_v20 = vld [vmem:[#allocation4 + $0x8] sm:$0xff] }
  0x1a   :  { %217 = vmatpush.msra.mxu1 %v746_v3  ;;  %247 = vmatpush.msra.mxu2 %v746_v3  ;;  %v103_v19 = vld [vmem:[#allocation7] sm:$0xff]  ;;  %v107_v27 = vld [vmem:[#allocation4 + $0x10] sm:$0xff]  ;;  %v108_v33 = vld [vmem:[#allocation4 + $0x18] sm:$0xff] }
  0x1b   :  { %276 = vmatpush.msra.mxu3 %v746_v3  ;;  %389 = vmatpush.msrb.mxu0 %v735_v0  ;;  %v900_v21 = vld [vmem:[%s926_s4] ss:$0 sm:$0xff]  ;;  %v110_v45 = vld [vmem:[#allocation4 + $0x28] sm:$0xff]  ;;  %v111_v46 = vld [vmem:[#allocation4 + $0x30] sm:$0xff]  ;;  %s683_s4 = smov [#allocation12]  }
  0x1c   :  { %218 = vmatpush.msra.mxu1 %v750_v7  ;;  %248 = vmatpush.msra.mxu2 %v750_v7  ;;  %v109_v39 = vld [vmem:[#allocation4 + $0x20] sm:$0xff]  ;;  %v112_v52 = vld [vmem:[#allocation4 + $0x38] sm:$0xff]  ;;  %s454_s13 = sshll.u32 %s683_s4, 4  ;;  %s455_s13 = int_to_ptr.vmem [resolvable:$true] %s454_s13 }
  0x1d   :  { %277 = vmatpush.msra.mxu3 %v750_v7  ;;  %390 = vmatpush.msrb.mxu0 %v737_v1 }
  0x1e   :  { %219 = vmatpush.msra.mxu1 %v755_v8  ;;  %249 = vmatpush.msra.mxu2 %v755_v8 }
  0x1f   :  { %278 = vmatpush.msra.mxu3 %v755_v8  ;;  %391 = vmatpush.msrb.mxu0 %v741_v2 }
  0x20   :  { %220 = vmatpush.msra.mxu1 %v761_v9  ;;  %250 = vmatpush.msra.mxu2 %v761_v9 }
  0x21   :  { %279 = vmatpush.msra.mxu3 %v761_v9  ;;  %392 = vmatpush.msrb.mxu0 %v746_v3 }
  0x22   :  { %221 = vmatpush.msra.mxu1 %v767_v10  ;;  %251 = vmatpush.msra.mxu2 %v767_v10 }
  0x23   :  { %280 = vmatpush.msra.mxu3 %v767_v10  ;;  %393 = vmatpush.msrb.mxu0 %v750_v7 }
  0x24   :  { %222 = vmatpush.msra.mxu1 %v773_v11  ;;  %252 = vmatpush.msra.mxu2 %v773_v11 }
  0x25   :  { %281 = vmatpush.msra.mxu3 %v773_v11  ;;  %394 = vmatpush.msrb.mxu0 %v755_v8 }
  0x26   :  { %223 = vmatpush.msra.mxu1 %v779_v12  ;;  %253 = vmatpush.msra.mxu2 %v779_v12 }
  0x27   :  { %282 = vmatpush.msra.mxu3 %v779_v12  ;;  %395 = vmatpush.msrb.mxu0 %v761_v9 }
  0x28   :  { %224 = vmatpush.msra.mxu1 %v785_v13  ;;  %254 = vmatpush.msra.mxu2 %v785_v13 }
  0x29   :  { %283 = vmatpush.msra.mxu3 %v785_v13  ;;  %396 = vmatpush.msrb.mxu0 %v767_v10 }
  0x2a   :  { %225 = vmatpush.msra.mxu1 %v791_v14  ;;  %255 = vmatpush.msra.mxu2 %v791_v14 }
  0x2b   :  { %284 = vmatpush.msra.mxu3 %v791_v14  ;;  %397 = vmatpush.msrb.mxu0 %v773_v11 }
  0x2c   :  { %226 = vmatpush.msra.mxu1 %v797_v15  ;;  %256 = vmatpush.msra.mxu2 %v797_v15 }
  0x2d   :  { %285 = vmatpush.msra.mxu3 %v797_v15  ;;  %398 = vmatpush.msrb.mxu0 %v779_v12 }
  0x2e   :  { %227 = vmatpush.msra.mxu1 %v803_v16  ;;  %257 = vmatpush.msra.mxu2 %v803_v16 }
  0x2f   :  { %286 = vmatpush.msra.mxu3 %v803_v16  ;;  %399 = vmatpush.msrb.mxu0 %v785_v13 }
  0x30   :  { %228 = vmatpush.msra.mxu1 %v809_v17  ;;  %258 = vmatpush.msra.mxu2 %v809_v17 }
  0x31   :  { %287 = vmatpush.msra.mxu3 %v809_v17  ;;  %400 = vmatpush.msrb.mxu0 %v791_v14 }
  0x32   :  { %229 = vmatpush.msra.mxu1 %v815_v18  ;;  %259 = vmatpush.msra.mxu2 %v815_v18 }
  0x33   :  { %230 = vmatmul.f32.vlgmr.msra.gmra.mxu1 %v103_v19  ;;  %288 = vmatpush.msra.mxu3 %v815_v18 }
  0x34   :  { %302 = vmatpush.msrb.mxu1 %v735_v0  ;;  %331 = vmatpush.msrb.mxu2 %v735_v0 }
  0x35   :  { %360 = vmatpush.msrb.mxu3 %v735_v0  ;;  %401 = vmatpush.msrb.mxu0 %v797_v15 }
  0x36   :  { %303 = vmatpush.msrb.mxu1 %v737_v1  ;;  %332 = vmatpush.msrb.mxu2 %v737_v1 }
  0x37   :  { %361 = vmatpush.msrb.mxu3 %v737_v1  ;;  %402 = vmatpush.msrb.mxu0 %v803_v16 }
  0x38   :  { %304 = vmatpush.msrb.mxu1 %v741_v2  ;;  %333 = vmatpush.msrb.mxu2 %v741_v2 }
  0x39   :  { %362 = vmatpush.msrb.mxu3 %v741_v2  ;;  %403 = vmatpush.msrb.mxu0 %v809_v17 }
  0x3a   :  { %305 = vmatpush.msrb.mxu1 %v746_v3  ;;  %334 = vmatpush.msrb.mxu2 %v746_v3 }
  0x3b   :  { %363 = vmatpush.msrb.mxu3 %v746_v3  ;;  %404 = vmatpush.msrb.mxu0 %v815_v18 }
  0x3c   :  { %306 = vmatpush.msrb.mxu1 %v750_v7  ;;  %335 = vmatpush.msrb.mxu2 %v750_v7 }
  0x3d   :  { %364 = vmatpush.msrb.mxu3 %v750_v7  ;;  %518 = vmatmul.msk.f32.gmra.mxu0 %vm119_vm0, %v106_v20 }
  0x3e   :  { %307 = vmatpush.msrb.mxu1 %v755_v8  ;;  %336 = vmatpush.msrb.mxu2 %v755_v8 }
  0x3f   :  { %365 = vmatpush.msrb.mxu3 %v755_v8 }
  0x40   :  { %308 = vmatpush.msrb.mxu1 %v761_v9  ;;  %337 = vmatpush.msrb.mxu2 %v761_v9 }
  0x41   :  { %366 = vmatpush.msrb.mxu3 %v761_v9 }
  0x42   :  { %309 = vmatpush.msrb.mxu1 %v767_v10  ;;  %338 = vmatpush.msrb.mxu2 %v767_v10 }
  0x43   :  { %367 = vmatpush.msrb.mxu3 %v767_v10 }
  0x44   :  { %310 = vmatpush.msrb.mxu1 %v773_v11  ;;  %339 = vmatpush.msrb.mxu2 %v773_v11 }
  0x45   :  { %368 = vmatpush.msrb.mxu3 %v773_v11  ;;  %519 = vmatmul.msk.f32.gmra.mxu0 %vm119_vm0, %v107_v27 }
  0x46   :  { %311 = vmatpush.msrb.mxu1 %v779_v12  ;;  %340 = vmatpush.msrb.mxu2 %v779_v12 }
  0x47   :  { %369 = vmatpush.msrb.mxu3 %v779_v12 }
  0x48   :  { %312 = vmatpush.msrb.mxu1 %v785_v13  ;;  %341 = vmatpush.msrb.mxu2 %v785_v13 }
  0x49   :  { %370 = vmatpush.msrb.mxu3 %v785_v13 }
  0x4a   :  { %313 = vmatpush.msrb.mxu1 %v791_v14  ;;  %342 = vmatpush.msrb.mxu2 %v791_v14 }
  0x4b   :  { %371 = vmatpush.msrb.mxu3 %v791_v14 }
  0x4c   :  { %314 = vmatpush.msrb.mxu1 %v797_v15  ;;  %343 = vmatpush.msrb.mxu2 %v797_v15 }
  0x4d   :  { %372 = vmatpush.msrb.mxu3 %v797_v15  ;;  %520 = vmatmul.msk.f32.gmra.mxu0 %vm119_vm0, %v108_v33 }
  0x4e   :  { %315 = vmatpush.msrb.mxu1 %v803_v16  ;;  %344 = vmatpush.msrb.mxu2 %v803_v16 }
  0x4f   :  { %373 = vmatpush.msrb.mxu3 %v803_v16 }
  0x50   :  { %316 = vmatpush.msrb.mxu1 %v809_v17  ;;  %345 = vmatpush.msrb.mxu2 %v809_v17 }
  0x51   :  { %374 = vmatpush.msrb.mxu3 %v809_v17 }
  0x52   :  { %317 = vmatpush.msrb.mxu1 %v815_v18  ;;  %346 = vmatpush.msrb.mxu2 %v815_v18 }
  0x53   :  { %375 = vmatpush.msrb.mxu3 %v815_v18 }
  0x54   :  { %418 = vmatpush.msra.mxu1 %v735_v0 }
  0x55   :  { %521 = vmatmul.msk.f32.gmra.mxu0 %vm119_vm0, %v109_v39 }
  0x56   :  { %419 = vmatpush.msra.mxu1 %v737_v1 }
  0x58   :  { %420 = vmatpush.msra.mxu1 %v741_v2 }
  0x5a   :  { %421 = vmatpush.msra.mxu1 %v746_v3 }
  0x5c   :  { %422 = vmatpush.msra.mxu1 %v750_v7 }
  0x5d   :  { %522 = vmatmul.msk.f32.gmra.mxu0 %vm119_vm0, %v110_v45 }
  0x5e   :  { %423 = vmatpush.msra.mxu1 %v755_v8 }
  0x60   :  { %424 = vmatpush.msra.mxu1 %v761_v9 }
  0x62   :  { %425 = vmatpush.msra.mxu1 %v767_v10 }
  0x64   :  { %426 = vmatpush.msra.mxu1 %v773_v11 }
  0x65   :  { %523 = vmatmul.msk.f32.gmra.mxu0 %vm119_vm0, %v111_v46 }
  0x66   :  { %427 = vmatpush.msra.mxu1 %v779_v12 }
  0x68   :  { %428 = vmatpush.msra.mxu1 %v785_v13 }
  0x6a   :  { %429 = vmatpush.msra.mxu1 %v791_v14 }
  0x6c   :  { %430 = vmatpush.msra.mxu1 %v797_v15 }
  0x6d   :  { %524 = vmatmul.msk.f32.gmra.mxu0 %vm119_vm0, %v112_v52 }
  0x6e   :  { %431 = vmatpush.msra.mxu1 %v803_v16 }
  0x70   :  { %432 = vmatpush.msra.mxu1 %v809_v17 }
  0x72   :  { %433 = vmatpush.msra.mxu1 %v815_v18 }
  0x96   :  { %v161_v22 = vpop.f32.mrf.mxu0 }
  0x97   :  { %v162_v23 = vadd.f32 %v900_v21, %v161_v22 }
  0xb0   :  { %v231_v24 = vpop.f32.mrf.mxu1 }
  0xb1   :  { %v234_v25 = vadd.f32 %v231_v24, %v162_v23 }
  0xb3   :  { %533 = vtanh.f32 %v234_v25 }
  0xb9   :  { %v534_v26 = vpop.eup %533 }
  0xba   :  { %237 = vst [vmem:[#allocation12] sm:$0xff] %v534_v26  ;;  %260 = vmatmul.f32.vlgmr.msra.gmra.mxu2 %v534_v26  ;;  %v164_v28 = vpop.f32.mrf.mxu0 }
  0xbb   :  { %v165_v29 = vadd.f32 %v900_v21, %v164_v28 }
  0xc2   :  { %v167_v34 = vpop.f32.mrf.mxu0 }
  0xc3   :  { %v168_v35 = vadd.f32 %v900_v21, %v167_v34 }
  0xca   :  { %v170_v40 = vpop.f32.mrf.mxu0 }
  0xcb   :  { %v171_v41 = vadd.f32 %v900_v21, %v170_v40 }
  0xd2   :  { %v173_v47 = vpop.f32.mrf.mxu0 }
  0xd3   :  { %v174_v48 = vadd.f32 %v900_v21, %v173_v47 }
  0xda   :  { %v176_v53 = vpop.f32.mrf.mxu0 }
  0xdb   :  { %v177_v54 = vadd.f32 %v900_v21, %v176_v53 }
  0xe2   :  { %v179_v58 = vpop.f32.mrf.mxu0 }
  0xe3   :  { %v180_v60 = vadd.f32 %v900_v21, %v179_v58 }
  0xea   :  { %v182_v59 = vpop.f32.mrf.mxu0 }
  0xeb   :  { %v183_v0 = vadd.f32 %v900_v21, %v182_v59 }
 0x13d   :  { %v261_v30 = vpop.f32.mrf.mxu2 }
 0x13e   :  { %v264_v31 = vadd.f32 %v261_v30, %v165_v29 }
 0x140   :  { %535 = vtanh.f32 %v264_v31 }
 0x146   :  { %v536_v32 = vpop.eup %535 }
 0x147   :  { %267 = vst [vmem:[#allocation12 + $0x8] sm:$0xff] %v536_v32  ;;  %289 = vmatmul.f32.vlgmr.msra.gmra.mxu3 %v536_v32 }
 0x1ca   :  { %v290_v36 = vpop.f32.mrf.mxu3 }
 0x1cb   :  { %v293_v37 = vadd.f32 %v290_v36, %v168_v35 }
 0x1cd   :  { %537 = vtanh.f32 %v293_v37 }
 0x1d3   :  { %v538_v38 = vpop.eup %537 }
 0x1d4   :  { %296 = vst [vmem:[#allocation12 + $0x10] sm:$0xff] %v538_v38  ;;  %318 = vmatmul.f32.vlgmr.msrb.gmra.mxu1 %v538_v38 }
 0x251   :  { %v319_v42 = vpop.f32.mrf.mxu1 }
 0x252   :  { %v322_v43 = vadd.f32 %v319_v42, %v171_v41 }
 0x254   :  { %539 = vtanh.f32 %v322_v43 }
 0x25a   :  { %v540_v44 = vpop.eup %539 }
 0x25b   :  { %325 = vst [vmem:[#allocation12 + $0x18] sm:$0xff] %v540_v44  ;;  %347 = vmatmul.f32.vlgmr.msrb.gmra.mxu2 %v540_v44 }
 0x2de   :  { %v348_v49 = vpop.f32.mrf.mxu2 }
 0x2df   :  { %v351_v50 = vadd.f32 %v348_v49, %v174_v48 }
 0x2e1   :  { %541 = vtanh.f32 %v351_v50 }
 0x2e7   :  { %v542_v51 = vpop.eup %541 }
 0x2e8   :  { %354 = vst [vmem:[#allocation12 + $0x20] sm:$0xff] %v542_v51  ;;  %376 = vmatmul.f32.vlgmr.msrb.gmra.mxu3 %v542_v51 }
 0x36b   :  { %v377_v55 = vpop.f32.mrf.mxu3 }
 0x36c   :  { %v380_v56 = vadd.f32 %v377_v55, %v177_v54 }
 0x36e   :  { %543 = vtanh.f32 %v380_v56 }
 0x374   :  { %v544_v57 = vpop.eup %543 }
 0x375   :  { %383 = vst [vmem:[#allocation12 + $0x28] sm:$0xff] %v544_v57  ;;  %405 = vmatmul.f32.vlgmr.msrb.gmra.mxu0 %v544_v57 }
 0x3f2   :  { %v406_v61 = vpop.f32.mrf.mxu0 }
 0x3f3   :  { %v409_v62 = vadd.f32 %v406_v61, %v180_v60 }
 0x3f5   :  { %545 = vtanh.f32 %v409_v62 }
 0x3fb   :  { %v546_v63 = vpop.eup %545 }
 0x3fc   :  { %412 = vst [vmem:[#allocation12 + $0x30] sm:$0xff] %v546_v63  ;;  %434 = vmatmul.f32.vlgmr.msra.gmra.mxu1 %v546_v63 }
 0x479   :  { %v435_v1 = vpop.f32.mrf.mxu1 }
 0x47a   :  { %v438_v2 = vadd.f32 %v435_v1, %v183_v0 }
 0x47c   :  { %547 = vtanh.f32 %v438_v2 }
 0x482   :  { %v548_v3 = vpop.eup %547 }
 0x483   :  { %441 = vst [vmem:[#allocation12 + $0x38] sm:$0xff] %v548_v3 }
 0x484   :  { %462 = dma.vmem_to_hbm [thread:$0]  %s455_s13, 1024, %s457_s16, [#allocation6], %s679_s28, %s679_s28, %s680_s29  }
 0x485   :  { %675 = dma.done.wait [#allocation6], 1024  }
 0x486   :  { %676 = vsyncadd [#allocation6], 4294966272 }
 0x487   :  { %467 = vsyncpa [#allocation5], 1 }
 0x488   :  { %468 = vsyncpa [#allocation8], 1 }
 0x489   :  { %469 = vsyncpa [#allocation11], 1 }
 0x48a   :  { %470 = vsyncpa [#allocation6], 1 }

</bundles_post_ra>
